<compile_context>
chip_gen: v6e
topology: v6e:2x2x1
jax: 0.10.0
libtpu: 0.0.40
codegen_flags: <defaults>
</compile_context>

<pallas_src>
import jax
import jax.numpy as jnp
from jax.experimental import pallas as pl
from jax.experimental.pallas import tpu as pltpu


def _copy_kernel(x_ref, o_ref):
    """Lane-dense 2D identity copy of one (RB, TK) block."""
    o_ref[...] = x_ref[...]


def _choose_tiles(N, K, itemsize, target_block_bytes):
    """Pick (RB, TK) satisfying the (8,128) BlockSpec rule with ~target-sized blocks."""
    # Sublane (row) tile: multiple of 8, or the full batch dim.
    if N % 8 == 0:
        RB = min(N, 64)
    else:
        RB = N

    # Lane tile: multiple of 128 (unmasked stores), or the full flattened dim.
    if K % 128 == 0:
        budget = max(128, (target_block_bytes // (RB * itemsize)) // 128 * 128)
        TK = min(K, budget)
        while K % TK != 0:          # prefer divisors of K -> no ragged edge blocks
            TK -= 128
        # Tiny-input case: ensure >= 2 grid steps so v7x's second TC has work.
        if (pl.cdiv(N, RB) * (K // TK)) < 2 and K >= 256:
            half = (K // 2) // 128 * 128
            while half >= 128 and K % half != 0:
                half -= 128
            if half >= 128:
                TK = half
    else:
        # K not 128-aligned: full-dim block is the only shape guaranteed to lower.
        TK = K
    return RB, TK


def flatten_forward(x, *, target_block_bytes=2 << 20):
    """Flatten forward: x (N, ...) -> (N, prod(...)), matching x.view(N, -1)."""
    N = x.shape[0]
    K = 1
    for d in x.shape[1:]:
        K *= d

    # Row-major flatten is free (metadata-only) in XLA; hoist it out of the
    # kernel so the kernel sees a lane-dense 2D array and does a straight copy.
    x2 = x.reshape(N, K)

    itemsize = jnp.dtype(x.dtype).itemsize
    RB, TK = _choose_tiles(N, K, itemsize, target_block_bytes)
    grid = (pl.cdiv(N, RB), pl.cdiv(K, TK))

    return pl.pallas_call(
        _copy_kernel,
        out_shape=jax.ShapeDtypeStruct((N, K), x.dtype),
        grid=grid,
        in_specs=[pl.BlockSpec((RB, TK), lambda i, j: (i, j))],
        out_specs=pl.BlockSpec((RB, TK), lambda i, j: (i, j)),
        compiler_params=pltpu.CompilerParams(
            # Every (i, j) block is independent -> both axes shardable across
            # TensorCores (megacore on v7x; no-op on v5e/v6e).
            dimension_semantics=("parallel", "parallel"),
            # Blocks <= ~2 MiB, so double-buffered in+out stays ~8 MiB: safe on
            # v7x (64 MiB physical) and raises v5e's 16 MiB scoped default.
            vmem_limit_bytes=32 * 1024 * 1024,
        ),
    )(x2)


if __name__ == "__main__":
    key = jax.random.PRNGKey(0)

    # Small shapes consistent with the module's usage (conv feature maps -> flatten).
    N, C, H, W = 2, 4, 16, 16
    x = jax.random.normal(key, (N, C, H, W), dtype=jnp.float32)

    out = jax.block_until_ready(flatten_forward(x))

    assert out.shape == (N, C * H * W), out.shape
    # Must match PyTorch's x.view(N, -1) (row-major flatten) bit-exactly.
    ref = x.reshape(N, -1)
    assert bool(jnp.array_equal(out, ref)), "flatten output mismatch vs reference"
    print("KERNEL_OK")
</pallas_src>

<mosaic_0001>
module attributes {stable_mosaic.version = 11 : i64} {
  func.func @_copy_kernel(%arg0: i32, %arg1: i32, %arg2: memref<2x512xf32, #tpu.memory_space<vmem>>, %arg3: memref<2x512xf32, #tpu.memory_space<vmem>>) attributes {dimension_semantics = [#tpu.dimension_semantics<parallel>, #tpu.dimension_semantics<parallel>], iteration_bounds = array<i64: 1, 2>, scalar_prefetch = 0 : i64, scratch_operands = 0 : i64, tpu.core_type = #tpu.core_type<tc>, window_params = [{transform_indices = @transform_0, window_bounds = array<i64: 2, 512>}, {transform_indices = @transform_1, window_bounds = array<i64: 2, 512>}]} {
    %c0 = arith.constant 0 : index
    %c0_0 = arith.constant 0 : index
    %0 = vector.load %arg2[%c0, %c0_0] : memref<2x512xf32, #tpu.memory_space<vmem>>, vector<2x512xf32>
    %c0_1 = arith.constant 0 : index
    %c0_2 = arith.constant 0 : index
    %1 = vector.load %arg3[%c0_1, %c0_2] : memref<2x512xf32, #tpu.memory_space<vmem>>, vector<2x512xf32>
    tpu.vector_store %arg3[%c0_1, %c0_2], %0 {strides = array<i32>} : memref<2x512xf32, #tpu.memory_space<vmem>>, vector<2x512xf32>,
    return
  }
  func.func @transform_0(%arg0: i32, %arg1: i32) -> (i32, i32) {
    %c0_i32 = arith.constant 0 : i32
    return %arg0, %arg1 : i32, i32
  }
  func.func @transform_1(%arg0: i32, %arg1: i32) -> (i32, i32) {
    %c0_i32 = arith.constant 0 : i32
    return %arg0, %arg1 : i32, i32
  }
}

</mosaic_0001>

<bundles_post_ra>
// kernel: tpu_custom_call.1
= control target key start
LH: loop header
LB: loop body
LE: loop exit
PB: predicated region body
PF: predicated region fallthrough
CT: control target
= control target key end

     0   :  { %6 = vsyncpa [#allocation3], 0  ;;  %s597_s0 = inlined_call_operand.hbm [shape: f32[2,1024], index: 0, kind: input, shape index: {}]   ;;  %s598_s1 = inlined_call_operand.hbm [shape: f32[2,1024], index: 1, kind: output, shape index: {}]  }
   0x1   :  { %8 = vsyncpa [#allocation3 + $0x1], 0 }
   0x2   :  { %9 = vsyncpa [#allocation4], 0 }
   0x3   :  { %11 = vsyncpa [#allocation4 + $0x1], 0  ;;  %s457_s6 = smov 0   ;;  %s459_s7 = smov 0  }
   0x4   :  { %s461_s8 = smov 0   ;;  %s463_s9 = smov 0  }
   0x5   :  { %s465_s10 = smov 0   ;;  %s467_s11 = smov 0  }
   0x6 LB: > { %s256_s12 = sadd.s32 4294967295, %s443_s11   ;;  %s257_s13 = sadd.s32 4294967294, %s443_s11   ;;  %s443_s11 = sphi %s467_s11, %s17_s11   ;;  %s439_s10 = sphi %s465_s10, %s610_s10   ;;  %s435_s9 = sphi %s463_s9, %s609_s9   ;;  %s431_s8 = sphi %s461_s8, %s608_s8   ;;  %s427_s7 = sphi %s459_s7, %s607_s7   ;;  %s423_s6 = sphi %s457_s6, %s606_s6  }
   0x7   : > { %s26_s14 = sadd.s32 1, %s439_s10  ;;  %s38_s15 = sadd.s32 1, %s431_s8 }
   0x8   : > { %p27_p0 = scmp.ge.s32.totalorder %s26_s14, 2  ;;  %p45_p1 = scmp.ne.s32.totalorder %s431_s8, %s427_s7 }
   0x9   : > { %p46_p2 = scmp.eq.s32.totalorder %s443_s11, 0  ;;  %p51_p3 = scmp.ne.s32.totalorder %s427_s7, %s423_s6 }
   0xa   : > { %s612_s14 = smov (%p27_p0, %s26_s14), 0  ;;  %p52_p5 = scmp.eq.s32.totalorder %s256_s12, 0 }
   0xb   : > { %p498_p4 = por %p46_p2, %p45_p1  ;;  %s34_s17 = ssub.s32 %s439_s10, %s612_s14 }
   0xc   : > { %p77_p6 = scmp.eq.s32.totalorder %s256_s12, 1  ;;  %p36_p7 = scmp.eq.s32.totalorder %s34_s17, 0 }
   0xd   : > { %p504_p8 = por %p52_p5, %p51_p3  ;;  %p83_p10 = scmp.eq.s32.totalorder %s257_s13, 1 }
   0xe   : > { %p508_p9 = por %p77_p6, %p45_p1  ;;  %p285_p13 = scmp.lt.s32.totalorder %s443_s11, 2 }
   0xf   : > { %s513_s20 = scalar_select %p36_p7, %s431_s8, %s38_s15  }
  0x10   : > { %p515_p11 = por %p83_p10, %p51_p3  ;;  %s103_s22 = sand.u32 1, %s431_s8  }
  0x11   : > { %s260_s23 = sshll.u32 %s103_s22, 3  ;;  %s271_s24 = sshll.u32 %s439_s10, 7 }
  0x12   : > { %s602_s21 = scalar_select %p515_p11, 1, 0 }
  0x13   : > { %s115_s27 = scalar_lea.hbm %s597_s0, %s271_s24  ;;  %s107_s28 = scalar_lea.vmem [#allocation2], %s260_s23 }
  0x14   : > { %s117_s29 = sshll.u32 %s107_s28, 4  ;;  %p528_p0 = pnand %p285_p13, %p498_p4  ;;  %s118_s29 = int_to_ptr.vmem [resolvable:$true] %s117_s29 }
  0x15   : > { %p263_p1 = scmp.ge.s32.totalorder %s443_s11, 1  ;;  %p122_p2 = scmp.lt.s32.totalorder %s443_s11, 3 }
  0x16   : > { %s104_s2 = scalar_lea.sflag [#allocation3], %s103_s22  ;;  %p337_p3 = pneg %p528_p0 }
  0x17   : > { %s348_s3 = scalar_lea.vmem %s118_s29, 128  ;;  %s445_s4 = smov [#allocation2]  }
  0x18   : > { %p349_p5 = scmp.ne.s32.totalorder %s118_s29, %s348_s3  ;;  %s353_s5 = sshll.u32 %s445_s4, 4  ;;  %s354_s5 = int_to_ptr.vmem [resolvable:$false] %s353_s5 }
  0x19   : > { %s355_s12 = scalar_lea.vmem %s354_s5, 256  ;;  %p356_p10 = scmp.lt.s32.totalorder %s118_s29, %s354_s5 }
  0x1a   : > { %p351_p6 = pnand %p349_p5, %p337_p3  ;;  %p357_p12 = scmp.lt.s32.totalorder %s355_s12, %s348_s3 }
  0x1c   : > { %p352_p7 = pneg %p351_p6  ;;  %p358_p4 = por %p357_p12, %p356_p10 }
  0x1e   : > { %p359_p13 = pnand %p358_p4, %p352_p7 }
  0x20   : > { %362 = shalt.err (!%p359_p13)
}
  0x21   : > { %280 = dma.hbm_to_vmem [thread:$0]  (!%p528_p0), %s115_s27, 128, %s118_s29, %s104_s2  }
  0x22   : > { %p123_p11 = pnand %p263_p1, %p122_p2 }
  0x23   : > { %s543_s13 = sand.u32 (!%p123_p11), 1, %s427_s7  }
  0x24   : > { %126 = sbr.rel (%p123_p11) target bundleno = 66 (0x42), region = 24  ;;  %s264_s15 = sshll.u32 (!%p123_p11), %s543_s13, 3 }
  0x25   : > { %s129_s16 = scalar_lea.sflag (!%p123_p11), [#allocation3], %s543_s13  ;;  %s132_s17 = scalar_lea.vmem (!%p123_p11), [#allocation2], %s264_s15 }
  0x29   : > { %414 = dma.done.wait (%p504_p8), %s129_s16, 128  }
  0x2a   : > { %416 = vsyncadd (%p504_p8), %s129_s16, 4294967168  ;;  %s150_s22 = scalar_lea.vmem [#allocation5], %s264_s15  ;;  %s272_s24 = sshll.u32 %s435_s9, 7  ;;  %v153_v0 = vld [vmem:[%s132_s17] sm:$0xff] }
  0x2b   : > { %s172_s23 = sshll.u32 %s150_s22, 4  ;;  %s170_s27 = scalar_lea.hbm %s598_s1, %s272_s24  ;;  %154 = vst [vmem:[%s150_s22] sm:$0xff] %v153_v0  ;;  %s552_s23 = int_to_ptr.vmem [resolvable:$true] %s172_s23 }
  0x2c   : > { %s156_s28 = scalar_lea.sflag [#allocation4], %s543_s13  ;;  %s363_s18 = scalar_lea.vmem %s552_s23, 128 }
  0x2d   : > { %p364_p8 = scmp.ne.s32.totalorder %s552_s23, %s363_s18  ;;  %s446_s29 = smov [#allocation5]  }
  0x2e   : > { %s367_s30 = sshll.u32 %s446_s29, 4  ;;  %s368_s30 = int_to_ptr.vmem [resolvable:$false] %s367_s30 }
  0x2f   : > { %p365_p11 = pnand %p364_p8, %p508_p9  ;;  %s369_s9 = scalar_lea.vmem %s368_s30, 256 }
  0x30   : > { %p370_p0 = scmp.lt.s32.totalorder %s552_s23, %s368_s30  ;;  %p371_p1 = scmp.lt.s32.totalorder %s369_s9, %s363_s18 }
  0x31   : > { %p366_p12 = pneg %p365_p11 }
  0x32   : > { %p372_p2 = por %p371_p1, %p370_p0 }
  0x34   : > { %p373_p3 = pnand %p372_p2, %p366_p12 }
  0x36   : > { %376 = shalt.err (!%p373_p3)
}
  0x37   : > { %s377_s2 = scalar_lea.hbm %s170_s27, 128  ;;  %s381_s5 = scalar_lea.hbm %s598_s1, 256 }
  0x38   : > { %p378_p5 = scmp.ne.s32.totalorder %s170_s27, %s377_s2  ;;  %p382_p10 = scmp.lt.s32.totalorder %s170_s27, %s598_s1 }
  0x39   : > { %p383_p4 = scmp.lt.s32.totalorder %s381_s5, %s377_s2 }
  0x3a   : > { %p379_p6 = pnand %p378_p5, %p508_p9 }
  0x3b   : > { %p384_p13 = por %p383_p4, %p382_p10 }
  0x3c   : > { %p380_p7 = pneg %p379_p6 }
  0x3e   : > { %p385_p8 = pnand %p384_p13, %p380_p7 }
  0x40   : > { %388 = shalt.err (!%p385_p8)
}
  0x41   : > { %275 = dma.vmem_to_hbm [thread:$0]  (%p508_p9), %s552_s23, 128, %s170_s27, %s156_s28  }
  0x42 PF: > { %s184_s15 = sand.u32 1, %s423_s6   ;;  %p604_p11 = scmp.ne.s32.totalorder %s602_s21, 0 }
  0x43   : > { %p605_p12 = scmp.ge.s32.totalorder %s443_s11, 2  ;;  %s185_s16 = scalar_lea.sflag [#allocation4], %s184_s15 }
  0x45   : > { %p282_p0 = pnand %p605_p12, %p604_p11 }
  0x47   : > { %p283_p1 = pneg %p282_p0 }
  0x49   : > { %418 = dma.done.wait (%p283_p1), %s185_s16, 128  }
  0x4a   : > { %420 = vsyncadd (%p283_p1), %s185_s16, 4294967168  ;;  %s17_s11 = sadd.s32 1, %s443_s11   ;;  %s606_s6 = smov %s427_s7 }
  0x4b   : > { %p14_p2 = scmp.ge.s32.totalorder %s17_s11, 4   ;;  %s607_s7 = smov %s431_s8 }
  0x4c   : > { %s608_s8 = smov %s513_s20  ;;  %s609_s9 = smov %s439_s10 }
  0x4d   : > { %s610_s10 = smov %s612_s14  ;;  %16 = sbr.rel (!%p14_p2) target bundleno = 6 (0x6), region = 69 }
  0x52   :  { %190 = vsyncpa [#allocation3], 1 }
  0x53   :  { %192 = vsyncpa [#allocation3 + $0x1], 1 }
  0x54   :  { %193 = vsyncpa [#allocation4], 1 }
  0x55   :  { %195 = vsyncpa [#allocation4 + $0x1], 1 }

</bundles_post_ra>
